<compile_context>
chip_gen: v7x
topology: tpu7x:2x2x1
jax: 0.10.0
libtpu: 0.0.40
codegen_flags: <defaults>
</compile_context>

<pallas_src>
import functools

import jax
import jax.numpy as jnp
from jax import lax
from jax.experimental import pallas as pl
from jax.experimental.pallas import tpu as pltpu


def _channel_attention_kernel(x_ref, w1t_ref, w2t_ref, o_ref,
                              sum_acc, max_acc, *,
                              hw_total, hw_tile, chunk, needs_mask):
    # x_ref:   (TB, C, hw_tile)   current batch-group / spatial tile
    # w1t_ref: (C, Hid)           fc1 weight, transposed (resident across grid)
    # w2t_ref: (Hid, C)           fc2 weight, transposed (resident across grid)
    # o_ref:   (TB, C)            output block (resident across the hw axis)
    # sum_acc/max_acc: (TB, C) f32 scratch accumulators
    hw_i = pl.program_id(1)

    # Init running accumulators on the first spatial step.
    @pl.when(hw_i == 0)
    def _():
        sum_acc[...] = jnp.zeros_like(sum_acc)
        max_acc[...] = jnp.full_like(max_acc, -jnp.inf)

    n_chunks = hw_tile // chunk
    # Lanes of this block that are still inside the true H*W extent (only
    # relevant for the partial last tile when needs_mask is True).
    valid = hw_total - hw_i * hw_tile
    zero = jnp.asarray(0, dtype=x_ref.dtype)
    neg_inf = jnp.asarray(-jnp.inf, dtype=x_ref.dtype)

    def reduce_chunk(ci, carry):
        s, m = carry
        if n_chunks == 1:
            start = 0
            xc = x_ref[...]                                   # (TB, C, hw_tile)
        else:
            start = pl.multiple_of(ci * chunk, chunk)
            xc = x_ref[:, :, pl.ds(start, chunk)]             # (TB, C, chunk)
        if needs_mask:
            lane = lax.broadcasted_iota(jnp.int32, xc.shape, 2) + start
            in_range = lane < valid
            xs = jnp.where(in_range, xc, zero)
            xm = jnp.where(in_range, xc, neg_inf)
        else:
            xs = xc
            xm = xc
        # Single pass over the chunk: both reductions reuse the same load.
        s = s + jnp.sum(xs, axis=-1, dtype=jnp.float32)
        m = jnp.maximum(m, jnp.max(xm, axis=-1).astype(jnp.float32))
        return s, m

    carry0 = (sum_acc[...], max_acc[...])
    if n_chunks <= 1:
        s, m = reduce_chunk(0, carry0)
    else:
        s, m = lax.fori_loop(0, n_chunks, reduce_chunk, carry0,
                             unroll=min(n_chunks, 8))
    sum_acc[...] = s
    max_acc[...] = m

    # Finalize: shared MLP on the stacked (avg, max) descriptors, then sigmoid.
    # The matmuls are tiny and run once per batch group — not worth tuning.
    @pl.when(hw_i == pl.num_programs(1) - 1)
    def _():
        tb = o_ref.shape[0]
        avg = sum_acc[...] * (1.0 / hw_total)                    # (TB, C)
        mx = max_acc[...]                                        # (TB, C)
        pooled = jnp.concatenate([avg, mx], axis=0)              # (2*TB, C)
        h = jnp.maximum(
            jnp.dot(pooled, w1t_ref[...],
                    preferred_element_type=jnp.float32), 0.0)    # (2*TB, Hid)
        y = jnp.dot(h, w2t_ref[...],
                    preferred_element_type=jnp.float32)          # (2*TB, C)
        out = jax.nn.sigmoid(y[:tb] + y[tb:])                    # (TB, C)
        o_ref[...] = out.astype(o_ref.dtype)


def _vmem_capacity_bytes():
    """Per-core VMEM capacity; conservative default if the query fails."""
    try:
        info = pltpu.get_tpu_info()
        cap = getattr(info, "vmem_capacity_bytes", None)
        if cap:
            return int(cap)
    except Exception:
        pass
    return 64 << 20   # conservative (v7x per-TensorCore VMEM)


def _pick_batch_tile(batch):
    """Batch tile must be a multiple of 8 dividing B, or B itself (so the
    (TB, C) output block is tiling-legal).  Prefer a tile that leaves >= 2
    steps on the parallel axis so v7x megacore has work for both cores."""
    cands = [t for t in range(8, batch + 1, 8) if batch % t == 0]
    for t in cands:                      # ascending: smallest legal tile first
        if batch // t >= 2:
            return t
    if cands:
        return cands[0]
    # TODO(synk): pad B to a multiple of 8 in the wrapper for large batches
    # that are not 8-aligned; for now use the (legal) full-batch block.
    return batch


def _pick_hw_tile(hw, tb, channels, itemsize, block_budget_bytes):
    """hw_tile is a multiple of 128 (or == hw) sized so one input block stays
    under the budget.  The grid uses cdiv, so hw_tile need not divide hw."""
    max_lanes = max(128, block_budget_bytes // (tb * channels * itemsize))
    if hw <= max_lanes:
        return hw
    return (max_lanes // 128) * 128


def channel_attention(x, w1, w2, *, max_block_bytes=None):
    """x: (B, C, H, W); w1: (Hid, C); w2: (C, Hid). Returns (B, C, 1, 1) f32."""
    B, C, H, W = x.shape
    hidden = w1.shape[0]
    hw = H * W
    itemsize = jnp.dtype(x.dtype).itemsize

    x_flat = x.reshape(B, C, hw)
    w1t = jnp.transpose(w1)   # (C, Hid)
    w2t = jnp.transpose(w2)   # (Hid, C)

    # Generation-aware VMEM sizing: 128 MiB VMEM on v5e/v6e, 64 MiB/TC on v7x.
    vmem_cap = _vmem_capacity_bytes()
    if vmem_cap >= (96 << 20):
        default_block_budget = 24 << 20       # big blocks: fewer grid steps
        vmem_limit_cap = 100 << 20
    else:
        default_block_budget = 8 << 20        # v7x: leave headroom in 64 MiB
        vmem_limit_cap = 48 << 20
    block_budget = (default_block_budget if max_block_bytes is None
                    else max_block_bytes)
    # Never let the block exceed what fits under the scoped-VMEM cap
    # (x is double-buffered: ~2.25x block + weights + scratch + headroom).
    block_budget = min(block_budget, int((vmem_limit_cap - (4 << 20)) / 2.25))

    tb = _pick_batch_tile(B)
    hw_tile = _pick_hw_tile(hw, tb, C, itemsize, block_budget)
    grid = (B // tb, pl.cdiv(hw, hw_tile))
    needs_mask = (hw % hw_tile) != 0

    # Chunk size for the single-pass in-block reduction.
    chunk = hw_tile
    for c in (512, 256, 128):
        if hw_tile > c and hw_tile % c == 0:
            chunk = c
            break

    block_bytes = tb * C * hw_tile * itemsize
    w_bytes = (w1.size + w2.size) * jnp.dtype(w1.dtype).itemsize
    scratch_out_bytes = 3 * tb * C * 4
    vmem_limit = int(2.25 * block_bytes) + w_bytes + scratch_out_bytes + (2 << 20)
    vmem_limit = int(min(max(vmem_limit, 16 << 20), vmem_limit_cap))

    cost = pl.CostEstimate(
        flops=2 * B * C * hw + 8 * B * C * hidden,
        transcendentals=B * C,
        bytes_accessed=x_flat.size * itemsize + w_bytes + B * C * 4,
    )

    kernel = functools.partial(
        _channel_attention_kernel,
        hw_total=hw, hw_tile=hw_tile, chunk=chunk, needs_mask=needs_mask)

    out = pl.pallas_call(
        kernel,
        out_shape=jax.ShapeDtypeStruct((B, C), jnp.float32),
        grid_spec=pltpu.PrefetchScalarGridSpec(
            num_scalar_prefetch=0,
            grid=grid,
            in_specs=[
                pl.BlockSpec((tb, C, hw_tile), lambda b, s: (b, 0, s)),
                pl.BlockSpec((C, hidden), lambda b, s: (0, 0)),
                pl.BlockSpec((hidden, C), lambda b, s: (0, 0)),
            ],
            out_specs=pl.BlockSpec((tb, C), lambda b, s: (b, 0)),
            scratch_shapes=[
                pltpu.VMEM((tb, C), jnp.float32),   # running sum
                pltpu.VMEM((tb, C), jnp.float32),   # running max
            ],
        ),
        compiler_params=pltpu.CompilerParams(
            dimension_semantics=("parallel", "arbitrary"),
            vmem_limit_bytes=vmem_limit,
        ),
        cost_estimate=cost,
    )(x_flat, w1t, w2t)

    return out.reshape(B, C, 1, 1)


def channel_attention_ref(x, w1, w2):
    """Pure-JAX reference mirroring the PyTorch module."""
    avg = jnp.mean(x, axis=(2, 3))                         # (B, C)
    mx = jnp.max(x, axis=(2, 3))                           # (B, C)

    def mlp(v):
        h = jnp.maximum(v @ w1.T, 0.0)                     # (B, Hid)
        return h @ w2.T                                    # (B, C)

    out = jax.nn.sigmoid(mlp(avg) + mlp(mx))
    return out[:, :, None, None]


if __name__ == "__main__":
    # Shapes consistent with the module: in_planes=64, ratio=16 -> hidden=4.
    B, C, H, W = 2, 64, 16, 16
    ratio = 16
    hidden = C // ratio

    key = jax.random.PRNGKey(0)
    kx, k1, k2, kx2, kx3 = jax.random.split(key, 5)
    x = jax.random.normal(kx, (B, C, H, W), dtype=jnp.float32)
    # Conv2d(in, out, 1, bias=False) weights squeezed to (out, in).
    w1 = jax.random.normal(k1, (hidden, C), dtype=jnp.float32) * 0.1
    w2 = jax.random.normal(k2, (C, hidden), dtype=jnp.float32) * 0.1

    out = jax.block_until_ready(channel_attention(x, w1, w2))
    ref = channel_attention_ref(x, w1, w2)
    assert out.shape == (B, C, 1, 1)
    assert jnp.allclose(out, ref, atol=1e-5, rtol=1e-5)

    # Non-128-multiple spatial extent + tiny budget: exercises the cdiv grid
    # with a masked partial last spatial tile.
    x2 = jax.random.normal(kx2, (B, C, 20, 20), dtype=jnp.float32)
    out2 = jax.block_until_ready(
        channel_attention(x2, w1, w2, max_block_bytes=128 * 1024))
    ref2 = channel_attention_ref(x2, w1, w2)
    assert out2.shape == (B, C, 1, 1)
    assert jnp.allclose(out2, ref2, atol=1e-5, rtol=1e-5)

    # Larger spatial extent: exercises the chunked single-pass sum/max
    # reduction and multiple "arbitrary" spatial grid steps.
    x3 = jax.random.normal(kx3, (B, C, 64, 64), dtype=jnp.float32)
    out3 = jax.block_until_ready(
        channel_attention(x3, w1, w2, max_block_bytes=512 * 1024))
    ref3 = channel_attention_ref(x3, w1, w2)
    assert out3.shape == (B, C, 1, 1)
    assert jnp.allclose(out3, ref3, atol=1e-5, rtol=1e-5)

    print("KERNEL_OK")
</pallas_src>

<mosaic_0001>
module attributes {stable_mosaic.version = 11 : i64} {
  func.func @_channel_attention_kernel(%arg0: i32, %arg1: i32, %arg2: memref<2x64x256xf32, #tpu.memory_space<vmem>>, %arg3: memref<64x4xf32, #tpu.memory_space<vmem>>, %arg4: memref<4x64xf32, #tpu.memory_space<vmem>>, %arg5: memref<2x64xf32, #tpu.memory_space<vmem>>, %arg6: memref<2x64xf32, #tpu.memory_space<vmem>>, %arg7: memref<2x64xf32, #tpu.memory_space<vmem>>) attributes {dimension_semantics = [#tpu.dimension_semantics<parallel>, #tpu.dimension_semantics<arbitrary>], iteration_bounds = array<i64: 1, 1>, scalar_prefetch = 0 : i64, scratch_operands = 2 : i64, tpu.core_type = #tpu.core_type<tc>, window_params = [{transform_indices = @transform_0, window_bounds = array<i64: 2, 64, 256>}, {pipeline_mode = #tpu.pipeline_mode<synchronous>, transform_indices = @transform_1, window_bounds = array<i64: 64, 4>}, {pipeline_mode = #tpu.pipeline_mode<synchronous>, transform_indices = @transform_2, window_bounds = array<i64: 4, 64>}, {transform_indices = @transform_3, window_bounds = array<i64: 2, 64>}]} {
    %c0_i32 = arith.constant 0 : i32
    %0 = arith.cmpi eq, %arg1, %c0_i32 : i32
    %1 = arith.extui %0 : i1 to i32
    %c0_i32_0 = arith.constant 0 : i32
    %2 = arith.cmpi ne, %1, %c0_i32_0 : i32
    scf.if %2 {
      %cst_19 = arith.constant 0.000000e+00 : f32
      %26 = vector.broadcast %cst_19 : f32 to vector<2x64xf32>
      %c0_20 = arith.constant 0 : index
      %c0_21 = arith.constant 0 : index
      %27 = vector.load %arg6[%c0_20, %c0_21] : memref<2x64xf32, #tpu.memory_space<vmem>>, vector<2x64xf32>
      tpu.vector_store %arg6[%c0_20, %c0_21], %26 {strides = array<i32>} : memref<2x64xf32, #tpu.memory_space<vmem>>, vector<2x64xf32>,
      %cst_22 = arith.constant 0xFF800000 : f32
      %28 = vector.broadcast %cst_22 : f32 to vector<2x64xf32>
      %c0_23 = arith.constant 0 : index
      %c0_24 = arith.constant 0 : index
      %29 = vector.load %arg7[%c0_23, %c0_24] : memref<2x64xf32, #tpu.memory_space<vmem>>, vector<2x64xf32>
      tpu.vector_store %arg7[%c0_23, %c0_24], %28 {strides = array<i32>} : memref<2x64xf32, #tpu.memory_space<vmem>>, vector<2x64xf32>,
    } else {
    }
    %c0 = arith.constant 0 : index
    %c0_1 = arith.constant 0 : index
    %3 = vector.load %arg6[%c0, %c0_1] : memref<2x64xf32, #tpu.memory_space<vmem>>, vector<2x64xf32>
    %c0_2 = arith.constant 0 : index
    %c0_3 = arith.constant 0 : index
    %4 = vector.load %arg7[%c0_2, %c0_3] : memref<2x64xf32, #tpu.memory_space<vmem>>, vector<2x64xf32>
    %c0_i32_4 = arith.constant 0 : i32
    %c128_i32 = arith.constant 128 : i32
    %5 = arith.muli %c0_i32_4, %c128_i32 : i32
    %6 = tpu.assume_multiple %5, 128 : i32
    %c0_5 = arith.constant 0 : index
    %c0_6 = arith.constant 0 : index
    %7 = arith.index_cast %6 : i32 to index
    %8 = vector.load %arg2[%c0_5, %c0_6, %7] : memref<2x64x256xf32, #tpu.memory_space<vmem>>, vector<2x64x128xf32>
    %cst = arith.constant dense<0.000000e+00> : vector<2x64xf32>
    %9 = vector.multi_reduction <add>, %8, %cst [2] : vector<2x64x128xf32> to vector<2x64xf32>
    %10 = arith.addf %3, %9 : vector<2x64xf32>
    %cst_7 = arith.constant dense<0xFF800000> : vector<2x64xf32>
    %11 = vector.multi_reduction <maximumf>, %8, %cst_7 [2] : vector<2x64x128xf32> to vector<2x64xf32>
    %12 = arith.maximumf %4, %11 : vector<2x64xf32>
    %c1_i32 = arith.constant 1 : i32
    %c128_i32_8 = arith.constant 128 : i32
    %13 = arith.muli %c1_i32, %c128_i32_8 : i32
    %14 = tpu.assume_multiple %13, 128 : i32
    %c0_9 = arith.constant 0 : index
    %c0_10 = arith.constant 0 : index
    %15 = arith.index_cast %14 : i32 to index
    %16 = vector.load %arg2[%c0_9, %c0_10, %15] : memref<2x64x256xf32, #tpu.memory_space<vmem>>, vector<2x64x128xf32>
    %cst_11 = arith.constant dense<0.000000e+00> : vector<2x64xf32>
    %17 = vector.multi_reduction <add>, %16, %cst_11 [2] : vector<2x64x128xf32> to vector<2x64xf32>
    %18 = arith.addf %10, %17 : vector<2x64xf32>
    %cst_12 = arith.constant dense<0xFF800000> : vector<2x64xf32>
    %19 = vector.multi_reduction <maximumf>, %16, %cst_12 [2] : vector<2x64x128xf32> to vector<2x64xf32>
    %20 = arith.maximumf %12, %19 : vector<2x64xf32>
    %c2_i32 = arith.constant 2 : i32
    %c0_13 = arith.constant 0 : index
    %c0_14 = arith.constant 0 : index
    %21 = vector.load %arg6[%c0_13, %c0_14] : memref<2x64xf32, #tpu.memory_space<vmem>>, vector<2x64xf32>
    tpu.vector_store %arg6[%c0_13, %c0_14], %18 {strides = array<i32>} : memref<2x64xf32, #tpu.memory_space<vmem>>, vector<2x64xf32>,
    %c0_15 = arith.constant 0 : index
    %c0_16 = arith.constant 0 : index
    %22 = vector.load %arg7[%c0_15, %c0_16] : memref<2x64xf32, #tpu.memory_space<vmem>>, vector<2x64xf32>
    tpu.vector_store %arg7[%c0_15, %c0_16], %20 {strides = array<i32>} : memref<2x64xf32, #tpu.memory_space<vmem>>, vector<2x64xf32>,
    %c0_i32_17 = arith.constant 0 : i32
    %23 = arith.cmpi eq, %arg1, %c0_i32_17 : i32
    %24 = arith.extui %23 : i1 to i32
    %c0_i32_18 = arith.constant 0 : i32
    %25 = arith.cmpi ne, %24, %c0_i32_18 : i32
    scf.if %25 {
      %c0_19 = arith.constant 0 : index
      %c0_20 = arith.constant 0 : index
      %26 = vector.load %arg6[%c0_19, %c0_20] : memref<2x64xf32, #tpu.memory_space<vmem>>, vector<2x64xf32>
      %cst_21 = arith.constant 3.906250e-03 : f32
      %27 = vector.broadcast %cst_21 : f32 to vector<2x64xf32>
      %28 = arith.mulf %26, %27 : vector<2x64xf32>
      %c0_22 = arith.constant 0 : index
      %c0_23 = arith.constant 0 : index
      %29 = vector.load %arg7[%c0_22, %c0_23] : memref<2x64xf32, #tpu.memory_space<vmem>>, vector<2x64xf32>
      %30 = tpu.concatenate %28, %29 in 0 : vector<2x64xf32>, vector<2x64xf32> -> vector<4x64xf32>
      %c0_24 = arith.constant 0 : index
      %c0_25 = arith.constant 0 : index
      %31 = vector.load %arg3[%c0_24, %c0_25] : memref<64x4xf32, #tpu.memory_space<vmem>>, vector<64x4xf32>
      %cst_26 = arith.constant dense<0.000000e+00> : vector<4x4xf32>
      %32 = tpu.matmul %30, %31, %cst_26 {dimension_numbers = #tpu.dot_dimension_numbers<[1], [0], [0], [1], [0, 0, 1, 1], [], []>} : vector<4x64xf32>, vector<64x4xf32>, vector<4x4xf32> -> vector<4x4xf32>
      %cst_27 = arith.constant 0.000000e+00 : f32
      %33 = vector.broadcast %cst_27 : f32 to vector<4x4xf32>
      %34 = arith.maximumf %32, %33 : vector<4x4xf32>
      %c0_28 = arith.constant 0 : index
      %c0_29 = arith.constant 0 : index
      %35 = vector.load %arg4[%c0_28, %c0_29] : memref<4x64xf32, #tpu.memory_space<vmem>>, vector<4x64xf32>
      %cst_30 = arith.constant dense<0.000000e+00> : vector<4x64xf32>
      %36 = tpu.matmul %34, %35, %cst_30 {dimension_numbers = #tpu.dot_dimension_numbers<[1], [0], [0], [1], [0, 0, 1, 1], [], []>} : vector<4x4xf32>, vector<4x64xf32>, vector<4x64xf32> -> vector<4x64xf32>
      %37 = vector.extract_strided_slice %36 {offsets = [0, 0], sizes = [2, 64], strides = [1, 1]} : vector<4x64xf32> to vector<2x64xf32>
      %38 = vector.extract_strided_slice %36 {offsets = [2, 0], sizes = [2, 64], strides = [1, 1]} : vector<4x64xf32> to vector<2x64xf32>
      %39 = arith.addf %37, %38 : vector<2x64xf32>
      %40 = arith.negf %39 : vector<2x64xf32>
      %41 = math.exp %40 : vector<2x64xf32>
      %cst_31 = arith.constant 1.000000e+00 : f32
      %42 = vector.broadcast %cst_31 : f32 to vector<2x64xf32>
      %43 = arith.addf %42, %41 : vector<2x64xf32>
      %44 = arith.divf %42, %43 : vector<2x64xf32>
      %c0_32 = arith.constant 0 : index
      %c0_33 = arith.constant 0 : index
      %45 = vector.load %arg5[%c0_32, %c0_33] : memref<2x64xf32, #tpu.memory_space<vmem>>, vector<2x64xf32>
      tpu.vector_store %arg5[%c0_32, %c0_33], %44 {strides = array<i32>} : memref<2x64xf32, #tpu.memory_space<vmem>>, vector<2x64xf32>,
    } else {
    }
    return
  }
  func.func @transform_0(%arg0: i32, %arg1: i32) -> (i32, i32, i32) {
    %c0_i32 = arith.constant 0 : i32
    %c0_i32_0 = arith.constant 0 : i32
    return %arg0, %c0_i32, %arg1 : i32, i32, i32
  }
  func.func @transform_1(%arg0: i32, %arg1: i32) -> (i32, i32) {
    %c0_i32 = arith.constant 0 : i32
    %c0_i32_0 = arith.constant 0 : i32
    %c0_i32_1 = arith.constant 0 : i32
    return %c0_i32, %c0_i32_0 : i32, i32
  }
  func.func @transform_2(%arg0: i32, %arg1: i32) -> (i32, i32) {
    %c0_i32 = arith.constant 0 : i32
    %c0_i32_0 = arith.constant 0 : i32
    %c0_i32_1 = arith.constant 0 : i32
    return %c0_i32, %c0_i32_0 : i32, i32
  }
  func.func @transform_3(%arg0: i32, %arg1: i32) -> (i32, i32) {
    %c0_i32 = arith.constant 0 : i32
    %c0_i32_0 = arith.constant 0 : i32
    return %arg0, %c0_i32 : i32, i32
  }
}

</mosaic_0001>

<bundles_post_ra>
// kernel: tpu_custom_call.1
= control target key start
LH: loop header
LB: loop body
LE: loop exit
PB: predicated region body
PF: predicated region fallthrough
CT: control target
= control target key end

     0   :  { %8 = vsyncpa [#allocation5], 0  ;;  %s1215_s0 = inlined_call_operand.hbm [shape: f32[2,64,256], index: 0, kind: input, shape index: {}]   ;;  %s1216_s1 = inlined_call_operand.vmem [shape: f32[64,4], index: 1, kind: input, shape index: {}]   ;;  %s1217_s2 = inlined_call_operand.vmem [shape: f32[4,64], index: 2, kind: input, shape index: {}]   ;;  %s1218_s3 = inlined_call_operand.hbm [shape: f32[2,64], index: 3, kind: output, shape index: {}]  }
   0x1   :  { %9 = vsyncpa [#allocation6], 0  ;;  %s917_s12 = smov [#allocation4]   ;;  %s869_s16 = scalar_lea.hbm %s1215_s0, 4096 }
   0x2   :  { %s15_s13 = sshll.u32 %s917_s12, 4  ;;  %p870_p0 = scmp.ne.s32.totalorder %s1215_s0, %s869_s16  ;;  %s16_s13 = int_to_ptr.vmem [resolvable:$true] %s15_s13 }
   0x3   :  { %p873_p1 = scmp.lt.u32.totalorder %s869_s16, %s1215_s0 }
   0x5   :  { %p875_p2 = pnand %p873_p1, %p870_p0 }
   0x7   :  { %878 = shalt.err (!%p875_p2)
}
   0x8   :  { %s879_s21 = scalar_lea.vmem %s16_s13, 4096  ;;  %p884_p4 = scmp.lt.s32.totalorder %s16_s13, %s16_s13 }
   0x9   :  { %p880_p3 = scmp.ne.s32.totalorder %s16_s13, %s879_s21  ;;  %p885_p5 = scmp.lt.s32.totalorder %s879_s21, %s879_s21 }
   0xb   :  { %p886_p6 = por %p885_p5, %p884_p4 }
   0xd   :  { %p887_p7 = pnand %p886_p6, %p880_p3 }
   0xf   :  { %890 = shalt.err (!%p887_p7)
}
  0x10   :  { %s918_s22 = smov 256   ;;  %s919_s23 = smov 16  }
  0x11   :  { %21 = dma.hbm_to_vmem [thread:$0]  %s1215_s0, 4096, %s16_s13, [#allocation5], %s918_s22, %s918_s22, %s919_s23  }
  0x12   :  { %913 = dma.done.wait [#allocation5], 4096  }
  0x13   :  { %914 = vsyncadd [#allocation5], 4294963200  ;;  %v46_v0 = vld [vmem:[#allocation4 + $0x80] sm:$0xff]  ;;  %v47_v2 = vld [vmem:[#allocation4 + $0x90] sm:$0xff]  ;;  %vm33_vm0 = vcmask 517120   ;;  %v920_v28 = vmov 0.0   ;;  %v102_v34 = vlaneseq }
  0x14   :  { %v38_v1 = vld [vmem:[#allocation4] sm:$0xff]  ;;  %70 = vadd.xlane.f32.xlu1 %v46_v0  ;;  %v39_v3 = vld [vmem:[#allocation4 + $0x10] sm:$0xff]  ;;  %v331_v8 = vld [vmem:[#allocation4 + $0x18] sm:$0xff]  ;;  %34 = vst.msk [vmem:[#allocation2] sm:$0x3] %vm33_vm0, %v920_v28  ;;  %840 = vmatprep.subr.mxu1 %v920_v28  ;;  %v921_v31 = vmov -inf  }
  0x15   :  { %54 = vadd.xlane.f32.xlu0 %v38_v1  ;;  %v48_v4 = vld [vmem:[#allocation4 + $0xa0] sm:$0xff]  ;;  %v49_v6 = vld [vmem:[#allocation4 + $0xb0] sm:$0xff]  ;;  %v330_v9 = vld [vmem:[#allocation4 + $0x8] sm:$0xff]  ;;  %35 = vst.msk [vmem:[#allocation3] sm:$0x3] %vm33_vm0, %v921_v31  ;;  %v959_v35 = vand.u32 127, %v102_v34 }
  0x16   :  { %v40_v5 = vld [vmem:[#allocation4 + $0x20] sm:$0xff]  ;;  %v41_v7 = vld [vmem:[#allocation4 + $0x30] sm:$0xff]  ;;  %v339_v10 = vld [vmem:[#allocation4 + $0x98] sm:$0xff]  ;;  %v967_v38 = vshrl.u32 %v102_v34, 7  ;;  %v922_v41 = vmov 0.0|0.0   ;;  %vm113_vm1 = vcmask 130112  }
  0x17   :  { %v338_v11 = vld [vmem:[#allocation4 + $0x88] sm:$0xff]  ;;  %v50_v12 = vld [vmem:[#allocation4 + $0xc0] sm:$0xff]  ;;  %v51_v16 = vld [vmem:[#allocation4 + $0xd0] sm:$0xff]  ;;  %v108_v39 = vadd.s32 4294967288, %v959_v35  ;;  %845 = vmatprep.subr.bf16.mxu0 %v922_v41  ;;  %vm923_vm2 = vmmov 0   ;;  %vm120_vm3 = vcmask 195712  }
  0x18   :  { %72 = vadd.xlane.f32.xlu1 %v47_v2  ;;  %v42_v13 = vld [vmem:[#allocation4 + $0x40] sm:$0xff]  ;;  %v340_v14 = vld [vmem:[#allocation4 + $0xa8] sm:$0xff]  ;;  %v43_v17 = vld [vmem:[#allocation4 + $0x50] sm:$0xff]  ;;  %v978_v46 = vsub.s32 %v959_v35, %v967_v38  ;;  %837 = vmatprep.mubr.msk.f32.mxu0 %vm923_vm2, %v920_v28  ;;  %vm127_vm4 = vcmask 261312   ;;  %vm134_vm5 = vcmask 326912   ;;  %vm141_vm6 = vcmask 392512  }
  0x19   :  { %56 = vadd.xlane.f32.xlu0 %v39_v3  ;;  %v332_v15 = vld [vmem:[#allocation4 + $0x28] sm:$0xff]  ;;  %v341_v18 = vld [vmem:[#allocation4 + $0xb8] sm:$0xff]  ;;  %v52_v20 = vld [vmem:[#allocation4 + $0xe0] sm:$0xff]  ;;  %v981_v47 = vsub.s32 %v108_v39, %v967_v38  ;;  %842 = vmatprep.mubr.msk.f32.mxu1 %vm923_vm2, %v920_v28  ;;  %vm148_vm7 = vcmask 458112   ;;  %vm155_vm8 = vcmask 523712   ;;  %vm196_vm9 = vcmask 1041409  }
  0x1a   :  { %v333_v19 = vld [vmem:[#allocation4 + $0x38] sm:$0xff]  ;;  %v44_v21 = vld [vmem:[#allocation4 + $0x60] sm:$0xff]  ;;  %v342_v22 = vld [vmem:[#allocation4 + $0xc8] sm:$0xff]  ;;  %vm616_vm10 = vcmask 1041408   ;;  %vm626_vm11 = vcmask 523264   ;;  %vm706_vm12 = vcmask 1043456  }
  0x1b   :  { %v334_v23 = vld [vmem:[#allocation4 + $0x48] sm:$0xff]  ;;  %v53_v24 = vld [vmem:[#allocation4 + $0xf0] sm:$0xff]  ;;  %v343_v26 = vld [vmem:[#allocation4 + $0xd8] sm:$0xff]  ;;  %vm702_vm13 = vcmask 31744   ;;  %s924_s15 = smov [#allocation7]  }
  0x1c   :  { %202 = vmax.xlane.f32.xlu1 %v39_v3  ;;  %v45_v25 = vld [vmem:[#allocation4 + $0x70] sm:$0xff]  ;;  %v335_v27 = vld [vmem:[#allocation4 + $0x58] sm:$0xff]  ;;  %v344_v29 = vld [vmem:[#allocation4 + $0xe8] sm:$0xff]  ;;  %v115_v3 = vadd.s32 4294967280, %v959_v35  ;;  %s797_s16 = sshll.u32 %s924_s15, 4  ;;  %s798_s16 = int_to_ptr.vmem [resolvable:$true] %s797_s16 }
  0x1d   :  { %200 = vmax.xlane.f32.xlu0 %v38_v1  ;;  %v336_v30 = vld [vmem:[#allocation4 + $0x68] sm:$0xff]  ;;  %v345_v32 = vld [vmem:[#allocation4 + $0xf8] sm:$0xff]  ;;  %p896_p9 = scmp.lt.s32.totalorder %s798_s16, %s798_s16 }
  0x1e   :  { %v337_v33 = vld [vmem:[#allocation4 + $0x78] sm:$0xff]  ;;  %v619_v37 = vld [vmem:[%s1216_s1 + $0x8] sm:$0xff]  ;;  %v620_v44 = vld [vmem:[%s1216_s1 + $0x10] sm:$0xff] }
  0x1f   :  { %v618_v36 = vld [vmem:[%s1216_s1] sm:$0xff]  ;;  %v621_v45 = vld [vmem:[%s1216_s1 + $0x18] sm:$0xff]  ;;  %v623_v50 = vld [vmem:[%s1216_s1 + $0x28] sm:$0xff] }
  0x20   :  { %218 = vmax.xlane.f32.xlu1 %v47_v2  ;;  %v846_v40 = vpack.c.bf16 %v619_v37, %v618_v36  ;;  %v849_v48 = vpack.c.bf16 %v621_v45, %v620_v44  ;;  %v622_v49 = vld [vmem:[%s1216_s1 + $0x20] sm:$0xff]  ;;  %v624_v54 = vld [vmem:[%s1216_s1 + $0x30] sm:$0xff]  ;;  %v625_v55 = vld [vmem:[%s1216_s1 + $0x38] sm:$0xff] }
  0x21   :  { %216 = vmax.xlane.f32.xlu0 %v46_v0  ;;  %v852_v53 = vpack.c.bf16 %v623_v50, %v622_v49  ;;  %v855_v62 = vpack.c.bf16 %v625_v55, %v624_v54  ;;  %v129_v55 = vadd.s32 4294967264, %v959_v35 }
  0x22   :  { %847 = vmatpush3.bf16.msra.mxu0 %v846_v40 }
  0x23   :  { %848 = vmatprep.subr.bf16.mxu0 %v922_v41 }
  0x24   :  { %74 = vadd.xlane.f32.xlu1 %v48_v4 }
  0x25   :  { %58 = vadd.xlane.f32.xlu0 %v40_v5 }
  0x26   :  { %850 = vmatpush3.bf16.msra.mxu0 %v849_v48 }
  0x27   :  { %851 = vmatprep.subr.bf16.mxu0 %v922_v41 }
  0x28   :  { %220 = vmax.xlane.f32.xlu1 %v48_v4 }
  0x29   :  { %204 = vmax.xlane.f32.xlu0 %v40_v5 }
  0x2a   :  { %853 = vmatpush3.bf16.msra.mxu0 %v852_v53 }
  0x2b   :  { %854 = vmatprep.subr.bf16.mxu0 %v922_v41 }
  0x2c   :  { %76 = vadd.xlane.f32.xlu1 %v49_v6 }
  0x2d   :  { %60 = vadd.xlane.f32.xlu0 %v41_v7 }
  0x2e   :  { %856 = vmatpush3.bf16.msra.mxu0 %v855_v62 }
  0x30   :  { %222 = vmax.xlane.f32.xlu1 %v49_v6 }
  0x31   :  { %206 = vmax.xlane.f32.xlu0 %v41_v7 }
  0x34   :  { %348 = vadd.xlane.f32.xlu1 %v331_v8 }
  0x35   :  { %346 = vadd.xlane.f32.xlu0 %v330_v9 }
  0x38   :  { %364 = vadd.xlane.f32.xlu1 %v339_v10 }
  0x39   :  { %362 = vadd.xlane.f32.xlu0 %v338_v11 }
  0x3c   :  { %477 = vmax.xlane.f32.xlu1 %v331_v8 }
  0x3d   :  { %475 = vmax.xlane.f32.xlu0 %v330_v9  ;;  %v1008_v9 = vsub.s32 %v115_v3, %v967_v38 }
  0x40   :  { %493 = vmax.xlane.f32.xlu1 %v339_v10 }
  0x41   :  { %491 = vmax.xlane.f32.xlu0 %v338_v11 }
  0x44   :  { %78 = vadd.xlane.f32.xlu1 %v50_v12 }
  0x45   :  { %62 = vadd.xlane.f32.xlu0 %v42_v13 }
  0x48   :  { %224 = vmax.xlane.f32.xlu1 %v50_v12 }
  0x49   :  { %208 = vmax.xlane.f32.xlu0 %v42_v13 }
  0x4c   :  { %366 = vadd.xlane.f32.xlu1 %v340_v14 }
  0x4d   :  { %350 = vadd.xlane.f32.xlu0 %v332_v15 }
  0x50   :  { %495 = vmax.xlane.f32.xlu1 %v340_v14 }
  0x51   :  { %479 = vmax.xlane.f32.xlu0 %v332_v15  ;;  %v122_v15 = vadd.s32 4294967272, %v959_v35 }
  0x54   :  { %80 = vadd.xlane.f32.xlu1 %v51_v16 }
  0x55   :  { %64 = vadd.xlane.f32.xlu0 %v43_v17 }
  0x58   :  { %226 = vmax.xlane.f32.xlu1 %v51_v16 }
  0x59   :  { %210 = vmax.xlane.f32.xlu0 %v43_v17 }
  0x5c   :  { %368 = vadd.xlane.f32.xlu1 %v341_v18 }
  0x5d   :  { %352 = vadd.xlane.f32.xlu0 %v333_v19 }
  0x60   :  { %497 = vmax.xlane.f32.xlu1 %v341_v18 }
  0x61   :  { %481 = vmax.xlane.f32.xlu0 %v333_v19 }
  0x64   :  { %82 = vadd.xlane.f32.xlu1 %v52_v20 }
  0x65   :  { %66 = vadd.xlane.f32.xlu0 %v44_v21 }
  0x68   :  { %228 = vmax.xlane.f32.xlu1 %v52_v20 }
  0x69   :  { %212 = vmax.xlane.f32.xlu0 %v44_v21 }
  0x6c   :  { %370 = vadd.xlane.f32.xlu1 %v342_v22 }
  0x6d   :  { %354 = vadd.xlane.f32.xlu0 %v334_v23 }
  0x70   :  { %499 = vmax.xlane.f32.xlu1 %v342_v22  ;;  %v1019_v22 = vsub.s32 %v122_v15, %v967_v38 }
  0x71   :  { %483 = vmax.xlane.f32.xlu0 %v334_v23 }
  0x74   :  { %84 = vadd.xlane.f32.xlu1 %v53_v24 }
  0x75   :  { %68 = vadd.xlane.f32.xlu0 %v45_v25 }
  0x78   :  { %230 = vmax.xlane.f32.xlu1 %v53_v24 }
  0x79   :  { %214 = vmax.xlane.f32.xlu0 %v45_v25 }
  0x7c   :  { %372 = vadd.xlane.f32.xlu1 %v343_v26 }
  0x7d   :  { %356 = vadd.xlane.f32.xlu0 %v335_v27 }
  0x80   :  { %501 = vmax.xlane.f32.xlu1 %v343_v26 }
  0x81   :  { %485 = vmax.xlane.f32.xlu0 %v335_v27 }
  0x84   :  { %374 = vadd.xlane.f32.xlu1 %v344_v29 }
  0x85   :  { %358 = vadd.xlane.f32.xlu0 %v336_v30 }
  0x88   :  { %503 = vmax.xlane.f32.xlu1 %v344_v29 }
  0x89   :  { %487 = vmax.xlane.f32.xlu0 %v336_v30 }
  0x8c   :  { %376 = vadd.xlane.f32.xlu1 %v345_v32 }
  0x8d   :  { %360 = vadd.xlane.f32.xlu0 %v337_v33 }
  0x90   :  { %505 = vmax.xlane.f32.xlu1 %v345_v32 }
  0x91   :  { %489 = vmax.xlane.f32.xlu0 %v337_v33 }
  0xa1   :  { %v71_v42 = vpop.xlane.xlu1 %70 }
  0xa2   :  { %v55_v43 = vpop.xlane.xlu0 %54  ;;  %v160_v56 = vrot.slane %v71_v42, %v978_v46 }
  0xa3   :  { %v107_v57 = vrot.slane %v55_v43, %v978_v46 }
  0xa5   :  { %v73_v51 = vpop.xlane.xlu1 %72 }
  0xa6   :  { %v57_v52 = vpop.xlane.xlu0 %56  ;;  %v164_v58 = vrot.slane %v73_v51, %v981_v47 }
  0xa7   :  { %v112_v59 = vrot.slane %v57_v52, %v981_v47 }
  0xa8   :  { %v165_v60 = vsel %vm113_vm1, %v164_v58, %v160_v56 }
  0xa9   :  { %v114_v61 = vsel %vm113_vm1, %v112_v59, %v107_v57  ;;  %v203_v63 = vpop.xlane.xlu1 %202 }
  0xaa   :  { %v201_v0 = vpop.xlane.xlu0 %200  ;;  %v255_v1 = vrot.slane %v203_v63, %v981_v47 }
  0xab   :  { %v251_v2 = vrot.slane %v201_v0, %v978_v46 }
  0xad   :  { %v256_v4 = vsel %vm113_vm1, %v255_v1, %v251_v2  ;;  %v219_v5 = vpop.xlane.xlu1 %218 }
  0xae   :  { %v217_v6 = vpop.xlane.xlu0 %216  ;;  %v294_v7 = vrot.slane %v219_v5, %v981_v47 }
  0xaf   :  { %v290_v8 = vrot.slane %v217_v6, %v978_v46 }
  0xb1   :  { %v295_v10 = vsel %vm113_vm1, %v294_v7, %v290_v8  ;;  %v75_v11 = vpop.xlane.xlu1 %74 }
  0xb2   :  { %v59_v12 = vpop.xlane.xlu0 %58  ;;  %v169_v13 = vrot.slane %v75_v11, %v1008_v9 }
  0xb3   :  { %v119_v14 = vrot.slane %v59_v12, %v1008_v9 }
  0xb4   :  { %v170_v16 = vsel %vm120_vm3, %v169_v13, %v165_v60 }
  0xb5   :  { %v121_v17 = vsel %vm120_vm3, %v119_v14, %v114_v61  ;;  %v221_v18 = vpop.xlane.xlu1 %220  ;;  %v1050_v61 = vsub.s32 %v129_v55, %v967_v38 }
  0xb6   :  { %v205_v19 = vpop.xlane.xlu0 %204  ;;  %v299_v20 = vrot.slane %v221_v18, %v1008_v9 }
  0xb7   :  { %v260_v21 = vrot.slane %v205_v19, %v1008_v9 }
  0xb8   :  { %v300_v23 = vsel %vm120_vm3, %v299_v20, %v295_v10 }
  0xb9   :  { %v261_v24 = vsel %vm120_vm3, %v260_v21, %v256_v4  ;;  %v77_v25 = vpop.xlane.xlu1 %76 }
  0xba   :  { %v61_v26 = vpop.xlane.xlu0 %60  ;;  %v174_v27 = vrot.slane %v77_v25, %v1019_v22  ;;  %v136_v25 = vadd.s32 4294967256, %v959_v35 }
  0xbb   :  { %v126_v28 = vrot.slane %v61_v26, %v1019_v22 }
  0xbc   :  { %v175_v29 = vsel %vm127_vm4, %v174_v27, %v170_v16 }
  0xbd   :  { %v128_v30 = vsel %vm127_vm4, %v126_v28, %v121_v17  ;;  %v223_v31 = vpop.xlane.xlu1 %222  ;;  %v143_v28 = vadd.s32 4294967248, %v959_v35 }
  0xbe   :  { %v207_v32 = vpop.xlane.xlu0 %206  ;;  %v304_v33 = vrot.slane %v223_v31, %v1019_v22 }
  0xbf   :  { %v265_v34 = vrot.slane %v207_v32, %v1019_v22  ;;  %v150_v32 = vadd.s32 4294967240, %v959_v35 }
  0xc0   :  { %v305_v36 = vsel %vm127_vm4, %v304_v33, %v300_v23  ;;  %v1090_v33 = vsub.s32 %v143_v28, %v967_v38 }
  0xc1   :  { %v266_v37 = vsel %vm127_vm4, %v265_v34, %v261_v24  ;;  %v349_v39 = vpop.xlane.xlu1 %348 }
  0xc2   :  { %v347_v40 = vpop.xlane.xlu0 %346  ;;  %v401_v41 = vrot.slane %v349_v39, %v981_v47 }
  0xc3   :  { %v397_v42 = vrot.slane %v347_v40, %v978_v46  ;;  %v1099_v40 = vsub.s32 %v150_v32, %v967_v38 }
  0xc5   :  { %v1034_v43 = vsel %vm113_vm1, %v401_v41, %v397_v42  ;;  %v365_v44 = vpop.xlane.xlu1 %364 }
  0xc6   :  { %v363_v45 = vpop.xlane.xlu0 %362  ;;  %v440_v48 = vrot.slane %v365_v44, %v981_v47 }
  0xc7   :  { %v436_v49 = vrot.slane %v363_v45, %v978_v46 }
  0xc9   :  { %v1039_v50 = vsel %vm113_vm1, %v440_v48, %v436_v49  ;;  %v478_v51 = vpop.xlane.xlu1 %477 }
  0xca   :  { %v476_v52 = vpop.xlane.xlu0 %475  ;;  %v530_v53 = vrot.slane %v478_v51, %v981_v47 }
  0xcb   :  { %v526_v54 = vrot.slane %v476_v52, %v978_v46 }
  0xcd   :  { %v1045_v56 = vsel %vm113_vm1, %v530_v53, %v526_v54  ;;  %v494_v57 = vpop.xlane.xlu1 %493 }
  0xce   :  { %v492_v58 = vpop.xlane.xlu0 %491  ;;  %v569_v59 = vrot.slane %v494_v57, %v981_v47 }
  0xcf   :  { %v565_v60 = vrot.slane %v492_v58, %v978_v46 }
  0xd1   :  { %v1053_v62 = vsel %vm113_vm1, %v569_v59, %v565_v60  ;;  %v79_v63 = vpop.xlane.xlu1 %78 }
  0xd2   :  { %v63_v0 = vpop.xlane.xlu0 %62  ;;  %v179_v1 = vrot.slane %v79_v63, %v1050_v61 }
  0xd3   :  { %v133_v2 = vrot.slane %v63_v0, %v1050_v61 }
  0xd4   :  { %v180_v3 = vsel %vm134_vm5, %v179_v1, %v175_v29  ;;  %v1082_v29 = vsub.s32 %v136_v25, %v967_v38 }
  0xd5   :  { %v135_v4 = vsel %vm134_vm5, %v133_v2, %v128_v30  ;;  %v225_v47 = vpop.xlane.xlu1 %224 }
  0xd6   :  { %v209_v5 = vpop.xlane.xlu0 %208  ;;  %v309_v46 = vrot.slane %v225_v47, %v1050_v61 }
  0xd7   :  { %v270_v6 = vrot.slane %v209_v5, %v1050_v61 }
  0xd8   :  { %v310_v7 = vsel %vm134_vm5, %v309_v46, %v305_v36 }
  0xd9   :  { %v271_v8 = vsel %vm134_vm5, %v270_v6, %v266_v37  ;;  %v1063_v10 = vpop.xlane.xlu1 %366 }
  0xda   :  { %v1065_v11 = vpop.xlane.xlu0 %350 }
  0xdb   :  { %v406_v25 = vrot.slane %v1065_v11, %v1008_v9 }
  0xdd   :  { %v1067_v12 = vpop.xlane.xlu1 %495 }
  0xde   :  { %v1069_v13 = vpop.xlane.xlu0 %479 }
  0xe1   :  { %v81_v14 = vpop.xlane.xlu1 %80 }
  0xe2   :  { %v65_v15 = vpop.xlane.xlu0 %64  ;;  %v184_v34 = vrot.slane %v81_v14, %v1082_v29 }
  0xe3   :  { %v140_v36 = vrot.slane %v65_v15, %v1082_v29 }
  0xe4   :  { %v185_v35 = vsel %vm141_vm6, %v184_v34, %v180_v3 }
  0xe5   :  { %v227_v16 = vpop.xlane.xlu1 %226  ;;  %v142_v44 = vsel %vm141_vm6, %v140_v36, %v135_v4 }
  0xe6   :  { %v211_v17 = vpop.xlane.xlu0 %210  ;;  %v314_v49 = vrot.slane %v227_v16, %v1082_v29 }
  0xe7   :  { %v275_v51 = vrot.slane %v211_v17, %v1082_v29 }
  0xe8   :  { %v315_v1 = vsel %vm141_vm6, %v314_v49, %v310_v7 }
  0xe9   :  { %v1071_v18 = vpop.xlane.xlu1 %368  ;;  %v276_v2 = vsel %vm141_vm6, %v275_v51, %v271_v8  ;;  %v445_v8 = vrot.slane %v1063_v10, %v1008_v9 }
  0xea   :  { %v1073_v19 = vpop.xlane.xlu0 %352  ;;  %v450_v28 = vrot.slane %v1071_v18, %v1019_v22 }
  0xeb   :  { %v411_v32 = vrot.slane %v1073_v19, %v1019_v22  ;;  %v407_v19 = vsel %vm120_vm3, %v406_v25, %v1034_v43 }
  0xed   :  { %v1075_v20 = vpop.xlane.xlu1 %497 }
  0xee   :  { %v1077_v21 = vpop.xlane.xlu0 %481  ;;  %v579_v10 = vrot.slane %v1075_v20, %v1019_v22 }
  0xef   :  { %v540_v34 = vrot.slane %v1077_v21, %v1019_v22 }
  0xf1   :  { %v83_v23 = vpop.xlane.xlu1 %82 }
  0xf2   :  { %v67_v24 = vpop.xlane.xlu0 %66  ;;  %v189_v41 = vrot.slane %v83_v23, %v1090_v33 }
  0xf3   :  { %v147_v42 = vrot.slane %v67_v24, %v1090_v33 }
  0xf4   :  { %v190_v53 = vsel %vm148_vm7, %v189_v41, %v185_v35 }
  0xf5   :  { %v229_v26 = vpop.xlane.xlu1 %228  ;;  %v149_v54 = vsel %vm148_vm7, %v147_v42, %v142_v44 }
  0xf6   :  { %v213_v27 = vpop.xlane.xlu0 %212  ;;  %v319_v55 = vrot.slane %v229_v26, %v1090_v33  ;;  %v574_v26 = vrot.slane %v1067_v12, %v1008_v9  ;;  %v446_v12 = vsel %vm120_vm3, %v445_v8, %v1039_v50 }
  0xf7   :  { %v280_v57 = vrot.slane %v213_v27, %v1090_v33  ;;  %v535_v27 = vrot.slane %v1069_v13, %v1008_v9  ;;  %v451_v50 = vsel %vm127_vm4, %v450_v28, %v446_v12 }
  0xf8   :  { %v320_v47 = vsel %vm148_vm7, %v319_v55, %v315_v1  ;;  %v575_v20 = vsel %vm120_vm3, %v574_v26, %v1053_v62  ;;  %v37_v1 = vld [vmem:[#allocation3] sm:$0x3] }
  0xf9   :  { %v1084_v30 = vpop.xlane.xlu1 %370  ;;  %v281_v5 = vsel %vm148_vm7, %v280_v57, %v276_v2  ;;  %v536_v22 = vsel %vm120_vm3, %v535_v27, %v1045_v56  ;;  %v580_v42 = vsel %vm127_vm4, %v579_v10, %v575_v20 }
  0xfa   :  { %v1086_v31 = vpop.xlane.xlu0 %354  ;;  %v455_v11 = vrot.slane %v1084_v30, %v1050_v61  ;;  %v412_v30 = vsel %vm127_vm4, %v411_v32, %v407_v19  ;;  %v541_v43 = vsel %vm127_vm4, %v540_v34, %v536_v22 }
  0xfb   :  { %v416_v9 = vrot.slane %v1086_v31, %v1050_v61 }
  0xfc   :  { %v456_v35 = vsel %vm134_vm5, %v455_v11, %v451_v50 }
  0xfd   :  { %v1094_v37 = vpop.xlane.xlu1 %499  ;;  %v417_v56 = vsel %vm134_vm5, %v416_v9, %v412_v30 }
  0xfe   :  { %v1096_v39 = vpop.xlane.xlu0 %483  ;;  %v584_v62 = vrot.slane %v1094_v37, %v1050_v61 }
  0xff   :  { %v545_v44 = vrot.slane %v1096_v39, %v1050_v61 }
 0x101   :  { %v85_v45 = vpop.xlane.xlu1 %84 }
 0x102   :  { %v69_v48 = vpop.xlane.xlu0 %68  ;;  %v194_v38 = vrot.slane %v85_v45, %v1099_v40 }
 0x103   :  { %v154_v52 = vrot.slane %v69_v48, %v1099_v40 }
 0x104   :  { %v195_v58 = vsel %vm155_vm8, %v194_v38, %v190_v53  ;;  %v36_v38 = vld [vmem:[#allocation2] sm:$0x3] }
 0x105   :  { %v156_v59 = vsel %vm155_vm8, %v154_v52, %v149_v54  ;;  %v231_v63 = vpop.xlane.xlu1 %230 }
 0x106   :  { %v1116_v60 = vsel %vm196_vm9, %v195_v58, %v156_v59  ;;  %v215_v0 = vpop.xlane.xlu0 %214  ;;  %v324_v3 = vrot.slane %v231_v63, %v1099_v40  ;;  %v585_v58 = vsel %vm134_vm5, %v584_v62, %v580_v42 }
 0x107   :  { %v285_v4 = vrot.slane %v215_v0, %v1099_v40  ;;  %v546_v0 = vsel %vm134_vm5, %v545_v44, %v541_v43 }
 0x108   :  { %v325_v46 = vsel %vm155_vm8, %v324_v3, %v320_v47 }
 0x109   :  { %v286_v6 = vsel %vm155_vm8, %v285_v4, %v281_v5  ;;  %v373_v15 = vpop.xlane.xlu1 %372 }
 0x10a   :  { %v1127_v14 = vsel %vm196_vm9, %v325_v46, %v286_v6  ;;  %v357_v16 = vpop.xlane.xlu0 %356  ;;  %v460_v13 = vrot.slane %v373_v15, %v1082_v29 }
 0x10b   :  { %v421_v21 = vrot.slane %v357_v16, %v1082_v29  ;;  %v328_v16 = vmax.f32 %v37_v1, %v1127_v14  ;;  %v701_v14 = vld [vmem:[%s1217_s2] sm:$0xf]  ;;  %s891_s2 = scalar_lea.vmem %s798_s16, 32 }
 0x10c   :  { %v461_v45 = vsel %vm141_vm6, %v460_v13, %v456_v35  ;;  %841 = vmatpush3.msk.msra.mxu1 %vm706_vm12, %v701_v14  ;;  %p892_p8 = scmp.ne.s32.totalorder %s798_s16, %s891_s2  ;;  %p897_p10 = scmp.lt.s32.totalorder %s891_s2, %s891_s2 }
 0x10d   :  { %v502_v7 = vpop.xlane.xlu1 %501  ;;  %v422_v52 = vsel %vm141_vm6, %v421_v21, %v417_v56 }
 0x10e   :  { %v486_v17 = vpop.xlane.xlu0 %485  ;;  %v589_v48 = vrot.slane %v502_v7, %v1082_v29  ;;  %p898_p11 = por %p897_p10, %p896_p9 }
 0x10f   :  { %v550_v53 = vrot.slane %v486_v17, %v1082_v29  ;;  %v199_v29 = vadd.f32 %v1116_v60, %v36_v38 }
 0x110   :  { %v590_v2 = vsel %vm141_vm6, %v589_v48, %v585_v58  ;;  %p899_p12 = pnand %p898_p11, %p892_p8 }
 0x111   :  { %v375_v23 = vpop.xlane.xlu1 %374  ;;  %v551_v5 = vsel %vm141_vm6, %v550_v53, %v546_v0 }
 0x112   :  { %v359_v24 = vpop.xlane.xlu0 %358  ;;  %v465_v31 = vrot.slane %v375_v23, %v1090_v33 }
 0x113   :  { %v426_v41 = vrot.slane %v359_v24, %v1090_v33 }
 0x114   :  { %v466_v55 = vsel %vm148_vm7, %v465_v31, %v461_v45 }
 0x115   :  { %v504_v18 = vpop.xlane.xlu1 %503  ;;  %v427_v57 = vsel %vm148_vm7, %v426_v41, %v422_v52 }
 0x116   :  { %v488_v36 = vpop.xlane.xlu0 %487  ;;  %v594_v61 = vrot.slane %v504_v18, %v1090_v33 }
 0x117   :  { %v555_v39 = vrot.slane %v488_v36, %v1090_v33 }
 0x118   :  { %v595_v15 = vsel %vm148_vm7, %v594_v61, %v590_v2 }
 0x119   :  { %v377_v49 = vpop.xlane.xlu1 %376  ;;  %v556_v60 = vsel %vm148_vm7, %v555_v39, %v551_v5 }
 0x11a   :  { %v361_v51 = vpop.xlane.xlu0 %360  ;;  %v470_v54 = vrot.slane %v377_v49, %v1099_v40 }
 0x11b   :  { %v431_v37 = vrot.slane %v361_v51, %v1099_v40 }
 0x11c   :  { %v471_v59 = vsel %vm155_vm8, %v470_v54, %v466_v55 }
 0x11d   :  { %v432_v63 = vsel %vm155_vm8, %v431_v37, %v427_v57  ;;  %v506_v4 = vpop.xlane.xlu1 %505 }
 0x11e   :  { %v472_v3 = vsel %vm196_vm9, %v471_v59, %v432_v63  ;;  %v490_v47 = vpop.xlane.xlu0 %489  ;;  %v599_v33 = vrot.slane %v506_v4, %v1099_v40 }
 0x11f   :  { %v560_v46 = vrot.slane %v490_v47, %v1099_v40  ;;  %v474_v6 = vadd.f32 %v472_v3, %v199_v29 }
 0x120   :  { %v600_v7 = vsel %vm155_vm8, %v599_v33, %v595_v15 }
 0x121   :  { %v561_v17 = vsel %vm155_vm8, %v560_v46, %v556_v60  ;;  %605 = vst.msk [vmem:[#allocation2] sm:$0x3] %vm33_vm0, %v474_v6 }
 0x122   :  { %v601_v8 = vsel %vm196_vm9, %v600_v7, %v561_v17 }
 0x123   :  { %v603_v23 = vmax.f32 %v328_v16, %v601_v8 }
 0x125   :  { %606 = vst.msk [vmem:[#allocation3] sm:$0x3] %vm33_vm0, %v603_v23 }
 0x128   :  { %v610_v24 = vld [vmem:[#allocation2] sm:$0x3] }
 0x129   :  { %v611_v25 = vmul.f32 0.00390625, %v610_v24 }
 0x12c   :  { %v612_v40 = vld [vmem:[#allocation3] sm:$0x3] }
 0x12d   :  { %v614_v26 = vrot.slane %v612_v40, 6 }
 0x12f   :  { %v617_v27 = vsel %vm616_vm10, %v611_v25, %v614_v26 }
 0x130   :  { %838 = vmatmul.mubr.msk.f32.vlgmr.msra.gmra.mrb[0].mxu0 %vm626_vm11, %v617_v27 }
 0x203   :  { %v696_v28 = vpop.f32.mrb[0].mxu0 }
 0x204   :  { %v700_v32 = vmax.f32 %v696_v28, 0.0  ;;  %v839_v10 = vpop.f32.mrb[1].mxu0 }
 0x206   :  { %843 = vmatmul.mubr.msk.f32.vlgmr.msra.gmra.mrb[0].mxu1 %vm702_vm13, %v700_v32 }
 0x2d9   :  { %v776_v34 = vpop.f32.mrb[0].mxu1 }
 0x2da   :  { %v781_v11 = vrot.slane %v776_v34, 2  ;;  %v844_v12 = vpop.f32.mrb[1].mxu1 }
 0x2dc   :  { %v783_v9 = vadd.f32 %v781_v11, %v776_v34 }
 0x2de   :  { %v809_v13 = vmul.f32 -1.442695, %v783_v9 }
 0x2e0   :  { %865 = vpow2.f32 %v809_v13 }
 0x2ea   :  { %v866_v18 = vpop.eup %865 }
 0x2eb   :  { %v787_v36 = vadd.f32 1.0, %v866_v18 }
 0x2ed   :  { %867 = vrcp.f32 %v787_v36 }
 0x2f7   :  { %v868_v19 = vpop.eup %867 }
 0x2f8   :  { %790 = vst.msk [vmem:[#allocation7] sm:$0x3] %vm33_vm0, %v868_v19 }
 0x2f9   :  { %902 = shalt.err (!%p899_p12)
}
 0x2fa   :  { %s903_s19 = scalar_lea.hbm %s1218_s3, 32 }
 0x2fb   :  { %p904_p13 = scmp.ne.s32.totalorder %s1218_s3, %s903_s19  ;;  %p907_p0 = scmp.lt.u32.totalorder %s903_s19, %s1218_s3 }
 0x2fd   :  { %p909_p1 = pnand %p907_p0, %p904_p13 }
 0x2ff   :  { %912 = shalt.err (!%p909_p1)
}
 0x300   :  { %800 = dma.vmem_to_hbm [thread:$0]  %s798_s16, 32, %s1218_s3, [#allocation6]  }
 0x301   :  { %915 = dma.done.wait [#allocation6], 32  }
 0x302   :  { %916 = vsyncadd [#allocation6], 4294967264 }
 0x303   :  { %804 = vsyncpa [#allocation5], 1 }
 0x304   :  { %805 = vsyncpa [#allocation6], 1 }

</bundles_post_ra>
